<compile_context>
chip_gen: v5e
topology: v5e:2x2
jax: 0.10.0
libtpu: 0.0.40
codegen_flags: <defaults>
</compile_context>

<pallas_src>
import functools

import jax
import jax.numpy as jnp
from jax.experimental import pallas as pl
from jax.experimental.pallas import tpu as pltpu


# --------------------------- shared LN epilogue ----------------------------- #
def _layernorm(x, gamma, beta, eps, out_dtype):
    # Two independent XLU reductions; var = E[x^2] - mean^2 avoids the
    # reduce -> subtract -> reduce serial chain.
    inv_n = 1.0 / x.shape[-1]
    s1 = jnp.sum(x, axis=-1, keepdims=True)
    s2 = jnp.sum(x * x, axis=-1, keepdims=True)
    mean = s1 * inv_n
    var = jnp.maximum(s2 * inv_n - mean * mean, 0.0)
    inv = jax.lax.rsqrt(var + eps)
    return ((x - mean) * inv * gamma + beta).astype(out_dtype)


# ------------------- primary kernel: VMEM-resident weight ------------------- #
def _bert_output_resident_kernel(h_ref, wt_ref, b_ref, res_ref,
                                 gamma_ref, beta_ref, out_ref, *, eps):
    # (tm, I) @ (I, H) on the MXU, f32 accumulation.
    acc = jnp.dot(h_ref[...], wt_ref[...], preferred_element_type=jnp.float32)
    x = acc + b_ref[...].astype(jnp.float32) + res_ref[...].astype(jnp.float32)
    out_ref[...] = _layernorm(x, gamma_ref[...], beta_ref[...], eps,
                              out_ref.dtype)


# ------------- fallback kernel: K-tiled (weight too big for VMEM) ----------- #
def _bert_output_ktiled_kernel(h_ref, wt_ref, b_ref, res_ref,
                               gamma_ref, beta_ref, out_ref, *acc_scratch,
                               eps):
    # If no scratch was allocated, accumulate directly into the (f32) output.
    acc_ref = acc_scratch[0] if acc_scratch else out_ref
    k = pl.program_id(1)

    @pl.when(k == 0)
    def _():
        # Fold bias + residual into the accumulator init so the serial
        # last-step epilogue only does LayerNorm.
        acc_ref[...] = (b_ref[...].astype(jnp.float32)
                        + res_ref[...].astype(jnp.float32))

    acc_ref[...] += jnp.dot(h_ref[...], wt_ref[...],
                            preferred_element_type=jnp.float32)

    @pl.when(k == pl.num_programs(1) - 1)
    def _():
        out_ref[...] = _layernorm(acc_ref[...], gamma_ref[...], beta_ref[...],
                                  eps, out_ref.dtype)


# ------------------------------- wrapper ------------------------------------ #
def bert_output_pallas(hidden_states, input_tensor, params, *, eps=1e-12,
                       block_tokens=256, block_k=512,
                       compute_dtype=jnp.bfloat16,
                       resident_weight_bytes=12 * 1024 * 1024):
    B, S, I = hidden_states.shape
    H = input_tensor.shape[-1]
    N = B * S
    out_dtype = input_tensor.dtype

    # ---- token tile ----
    tm = min(block_tokens, N)
    # Prefer >= 2 token tiles so the "parallel" axis can shard across both
    # TensorCores on v7x.
    if N // tm < 2 and tm % 16 == 0:
        tm //= 2
    assert N % tm == 0, "token tile must divide N = B*S"
    assert (tm % 8 == 0) or (tm == N), "token tile must be a multiple of 8"

    itemsize = jnp.dtype(compute_dtype).itemsize
    out_itemsize = jnp.dtype(out_dtype).itemsize
    f32 = 4

    h_flat = hidden_states.reshape(N, I).astype(compute_dtype)
    res_flat = input_tensor.reshape(N, H)

    wt = params["wt"]                          # (I, H), transposed once at init
    if wt.dtype != compute_dtype:
        wt = wt.astype(compute_dtype)
    bias = params["b"].reshape(1, H).astype(jnp.float32)
    gamma = params["gamma"].reshape(1, H).astype(jnp.float32)
    beta = params["beta"].reshape(1, H).astype(jnp.float32)

    resident = I * H * itemsize <= resident_weight_bytes

    if resident:
        # -------- 1-D token grid, W^T VMEM-resident, fused LN epilogue -------
        est = (2 * tm * I * itemsize            # activations (double-buffered)
               + 2 * I * H * itemsize           # resident W^T
               + 2 * tm * H * f32               # residual
               + 2 * tm * H * out_itemsize      # output
               + 6 * H * f32)                   # bias / gamma / beta
        vmem_limit = int(min(2 * est + (2 << 20), 64 << 20))

        out_flat = pl.pallas_call(
            functools.partial(_bert_output_resident_kernel, eps=eps),
            grid_spec=pltpu.PrefetchScalarGridSpec(
                num_scalar_prefetch=0,
                grid=(N // tm,),
                in_specs=[
                    pl.BlockSpec((tm, I), lambda i: (i, 0)),   # activations
                    pl.BlockSpec((I, H), lambda i: (0, 0)),    # W^T (resident)
                    pl.BlockSpec((1, H), lambda i: (0, 0)),    # bias
                    pl.BlockSpec((tm, H), lambda i: (i, 0)),   # residual
                    pl.BlockSpec((1, H), lambda i: (0, 0)),    # gamma
                    pl.BlockSpec((1, H), lambda i: (0, 0)),    # beta
                ],
                out_specs=pl.BlockSpec((tm, H), lambda i: (i, 0)),
            ),
            out_shape=jax.ShapeDtypeStruct((N, H), out_dtype),
            compiler_params=pltpu.CompilerParams(
                dimension_semantics=("parallel",),
                vmem_limit_bytes=vmem_limit),
        )(h_flat, wt, bias, res_flat, gamma, beta)
    else:
        # ----------------- K-tiled fallback with f32 accumulator -------------
        tk = min(block_k, I)
        assert I % tk == 0, "K tile must divide intermediate_size"
        assert (tk % 128 == 0) or (tk == I), "K tile must be lane-aligned"

        use_scratch = out_dtype != jnp.float32
        est = (2 * tm * tk * itemsize + 2 * tk * H * itemsize
               + 2 * tm * H * f32 + 2 * tm * H * out_itemsize
               + (tm * H * f32 if use_scratch else 0) + 6 * H * f32)
        vmem_limit = int(min(2 * est + (2 << 20), 64 << 20))
        scratch = [pltpu.VMEM((tm, H), jnp.float32)] if use_scratch else []

        out_flat = pl.pallas_call(
            functools.partial(_bert_output_ktiled_kernel, eps=eps),
            grid_spec=pltpu.PrefetchScalarGridSpec(
                num_scalar_prefetch=0,
                grid=(N // tm, I // tk),
                in_specs=[
                    pl.BlockSpec((tm, tk), lambda i, k: (i, k)),  # activations
                    pl.BlockSpec((tk, H), lambda i, k: (k, 0)),   # W^T slab
                    pl.BlockSpec((1, H), lambda i, k: (0, 0)),    # bias
                    pl.BlockSpec((tm, H), lambda i, k: (i, 0)),   # residual
                    pl.BlockSpec((1, H), lambda i, k: (0, 0)),    # gamma
                    pl.BlockSpec((1, H), lambda i, k: (0, 0)),    # beta
                ],
                out_specs=pl.BlockSpec((tm, H), lambda i, k: (i, 0)),
                scratch_shapes=scratch,
            ),
            out_shape=jax.ShapeDtypeStruct((N, H), out_dtype),
            compiler_params=pltpu.CompilerParams(
                dimension_semantics=("parallel", "arbitrary"),
                vmem_limit_bytes=vmem_limit),
        )(h_flat, wt, bias, res_flat, gamma, beta)

    return out_flat.reshape(B, S, H)


# --------------------------- pure-JAX reference ------------------------------ #
def bert_output_ref(hidden_states, input_tensor, params, *, eps=1e-12):
    h = jnp.einsum("bsi,hi->bsh", hidden_states, params["w"]) + params["b"]
    x = h + input_tensor                       # dropout == identity (eval mode)
    mean = x.mean(-1, keepdims=True)
    var = ((x - mean) ** 2).mean(-1, keepdims=True)
    return (x - mean) / jnp.sqrt(var + eps) * params["gamma"] + params["beta"]


# ------------------------------ param setup ---------------------------------- #
def init_params(key, intermediate_size, hidden_size, *,
                compute_dtype=jnp.bfloat16):
    k_w, k_b = jax.random.split(key, 2)
    std = 0.02
    w = std * jax.random.normal(k_w, (hidden_size, intermediate_size),
                                jnp.float32)       # torch Linear: (out, in)
    return {
        "w": w,                                    # f32, for the reference
        "wt": w.T.astype(compute_dtype),           # one-time transpose + cast
        "b": std * jax.random.normal(k_b, (hidden_size,), jnp.float32),
        "gamma": jnp.ones((hidden_size,), jnp.float32),   # LayerNorm weight
        "beta": jnp.zeros((hidden_size,), jnp.float32),   # LayerNorm bias
    }


if __name__ == "__main__":
    # small config: batch=2, seq=8, intermediate=512, hidden=128
    B, S, INTERMEDIATE, HIDDEN = 2, 8, 512, 128
    EPS = 1e-12

    key = jax.random.PRNGKey(0)
    kp, k1, k2 = jax.random.split(key, 3)

    params = init_params(kp, INTERMEDIATE, HIDDEN)
    hidden_states = jax.random.normal(k1, (B, S, INTERMEDIATE), jnp.float32)
    input_tensor = jax.random.normal(k2, (B, S, HIDDEN), jnp.float32)

    out = bert_output_pallas(hidden_states, input_tensor, params, eps=EPS)
    out = jax.block_until_ready(out)

    ref = bert_output_ref(hidden_states, input_tensor, params, eps=EPS)
    assert out.shape == (B, S, HIDDEN)
    # bf16 MXU operands -> slightly looser tolerance vs. the f32 reference.
    assert jnp.allclose(out, ref, atol=2e-2, rtol=2e-2), "mismatch vs. reference"

    print("KERNEL_OK")
</pallas_src>

<mosaic_0001>
module attributes {stable_mosaic.version = 11 : i64} {
  func.func @_bert_output_resident_kernel(%arg0: i32, %arg1: memref<8x512xbf16, #tpu.memory_space<vmem>>, %arg2: memref<512x128xbf16, #tpu.memory_space<vmem>>, %arg3: memref<1x128xf32, #tpu.memory_space<vmem>>, %arg4: memref<8x128xf32, #tpu.memory_space<vmem>>, %arg5: memref<1x128xf32, #tpu.memory_space<vmem>>, %arg6: memref<1x128xf32, #tpu.memory_space<vmem>>, %arg7: memref<8x128xf32, #tpu.memory_space<vmem>>) attributes {dimension_semantics = [#tpu.dimension_semantics<parallel>], iteration_bounds = array<i64: 2>, scalar_prefetch = 0 : i64, scratch_operands = 0 : i64, tpu.core_type = #tpu.core_type<tc>, window_params = [{transform_indices = @transform_0, window_bounds = array<i64: 8, 512>}, {pipeline_mode = #tpu.pipeline_mode<synchronous>, transform_indices = @transform_1, window_bounds = array<i64: 512, 128>}, {pipeline_mode = #tpu.pipeline_mode<synchronous>, transform_indices = @transform_2, window_bounds = array<i64: 1, 128>}, {transform_indices = @transform_3, window_bounds = array<i64: 8, 128>}, {pipeline_mode = #tpu.pipeline_mode<synchronous>, transform_indices = @transform_4, window_bounds = array<i64: 1, 128>}, {pipeline_mode = #tpu.pipeline_mode<synchronous>, transform_indices = @transform_5, window_bounds = array<i64: 1, 128>}, {transform_indices = @transform_6, window_bounds = array<i64: 8, 128>}]} {
    %c0 = arith.constant 0 : index
    %c0_0 = arith.constant 0 : index
    %0 = vector.load %arg1[%c0, %c0_0] : memref<8x512xbf16, #tpu.memory_space<vmem>>, vector<8x512xbf16>
    %c0_1 = arith.constant 0 : index
    %c0_2 = arith.constant 0 : index
    %1 = vector.load %arg2[%c0_1, %c0_2] : memref<512x128xbf16, #tpu.memory_space<vmem>>, vector<512x128xbf16>
    %cst = arith.constant dense<0.000000e+00> : vector<8x128xf32>
    %2 = tpu.matmul %0, %1, %cst {dimension_numbers = #tpu.dot_dimension_numbers<[1], [0], [0], [1], [0, 0, 1, 1], [], []>} : vector<8x512xbf16>, vector<512x128xbf16>, vector<8x128xf32> -> vector<8x128xf32>
    %c0_3 = arith.constant 0 : index
    %c0_4 = arith.constant 0 : index
    %3 = vector.load %arg3[%c0_3, %c0_4] : memref<1x128xf32, #tpu.memory_space<vmem>>, vector<1x128xf32>
    %4 = vector.broadcast %3 : vector<1x128xf32> to vector<8x128xf32>
    %5 = arith.addf %2, %4 : vector<8x128xf32>
    %c0_5 = arith.constant 0 : index
    %c0_6 = arith.constant 0 : index
    %6 = vector.load %arg4[%c0_5, %c0_6] : memref<8x128xf32, #tpu.memory_space<vmem>>, vector<8x128xf32>
    %7 = arith.addf %5, %6 : vector<8x128xf32>
    %c0_7 = arith.constant 0 : index
    %c0_8 = arith.constant 0 : index
    %8 = vector.load %arg5[%c0_7, %c0_8] : memref<1x128xf32, #tpu.memory_space<vmem>>, vector<1x128xf32>
    %c0_9 = arith.constant 0 : index
    %c0_10 = arith.constant 0 : index
    %9 = vector.load %arg6[%c0_9, %c0_10] : memref<1x128xf32, #tpu.memory_space<vmem>>, vector<1x128xf32>
    %cst_11 = arith.constant dense<0.000000e+00> : vector<8xf32>
    %10 = vector.multi_reduction <add>, %7, %cst_11 [1] : vector<8x128xf32> to vector<8xf32>
    %11 = vector.shape_cast %10 : vector<8xf32> to vector<8x1xf32>
    %12 = arith.mulf %7, %7 : vector<8x128xf32>
    %cst_12 = arith.constant dense<0.000000e+00> : vector<8xf32>
    %13 = vector.multi_reduction <add>, %12, %cst_12 [1] : vector<8x128xf32> to vector<8xf32>
    %14 = vector.shape_cast %13 : vector<8xf32> to vector<8x1xf32>
    %cst_13 = arith.constant 7.812500e-03 : f32
    %15 = vector.broadcast %cst_13 : f32 to vector<8x1xf32>
    %16 = arith.mulf %11, %15 : vector<8x1xf32>
    %cst_14 = arith.constant 7.812500e-03 : f32
    %17 = vector.broadcast %cst_14 : f32 to vector<8x1xf32>
    %18 = arith.mulf %14, %17 : vector<8x1xf32>
    %19 = arith.mulf %16, %16 : vector<8x1xf32>
    %20 = arith.subf %18, %19 : vector<8x1xf32>
    %cst_15 = arith.constant 0.000000e+00 : f32
    %21 = vector.broadcast %cst_15 : f32 to vector<8x1xf32>
    %22 = arith.maximumf %20, %21 : vector<8x1xf32>
    %cst_16 = arith.constant 9.99999996E-13 : f32
    %23 = vector.broadcast %cst_16 : f32 to vector<8x1xf32>
    %24 = arith.addf %22, %23 : vector<8x1xf32>
    %25 = math.rsqrt %24 : vector<8x1xf32>
    %26 = vector.broadcast %16 : vector<8x1xf32> to vector<8x128xf32>
    %27 = arith.subf %7, %26 : vector<8x128xf32>
    %28 = vector.broadcast %25 : vector<8x1xf32> to vector<8x128xf32>
    %29 = arith.mulf %27, %28 : vector<8x128xf32>
    %30 = vector.broadcast %8 : vector<1x128xf32> to vector<8x128xf32>
    %31 = arith.mulf %29, %30 : vector<8x128xf32>
    %32 = vector.broadcast %9 : vector<1x128xf32> to vector<8x128xf32>
    %33 = arith.addf %31, %32 : vector<8x128xf32>
    %c0_17 = arith.constant 0 : index
    %c0_18 = arith.constant 0 : index
    %34 = vector.load %arg7[%c0_17, %c0_18] : memref<8x128xf32, #tpu.memory_space<vmem>>, vector<8x128xf32>
    tpu.vector_store %arg7[%c0_17, %c0_18], %33 {strides = array<i32>} : memref<8x128xf32, #tpu.memory_space<vmem>>, vector<8x128xf32>,
    return
  }
  func.func @transform_0(%arg0: i32) -> (i32, i32) {
    %c0_i32 = arith.constant 0 : i32
    %c0_i32_0 = arith.constant 0 : i32
    return %arg0, %c0_i32 : i32, i32
  }
  func.func @transform_1(%arg0: i32) -> (i32, i32) {
    %c0_i32 = arith.constant 0 : i32
    %c0_i32_0 = arith.constant 0 : i32
    %c0_i32_1 = arith.constant 0 : i32
    return %c0_i32, %c0_i32_0 : i32, i32
  }
  func.func @transform_2(%arg0: i32) -> (i32, i32) {
    %c0_i32 = arith.constant 0 : i32
    %c0_i32_0 = arith.constant 0 : i32
    %c0_i32_1 = arith.constant 0 : i32
    return %c0_i32, %c0_i32_0 : i32, i32
  }
  func.func @transform_3(%arg0: i32) -> (i32, i32) {
    %c0_i32 = arith.constant 0 : i32
    %c0_i32_0 = arith.constant 0 : i32
    return %arg0, %c0_i32 : i32, i32
  }
  func.func @transform_4(%arg0: i32) -> (i32, i32) {
    %c0_i32 = arith.constant 0 : i32
    %c0_i32_0 = arith.constant 0 : i32
    %c0_i32_1 = arith.constant 0 : i32
    return %c0_i32, %c0_i32_0 : i32, i32
  }
  func.func @transform_5(%arg0: i32) -> (i32, i32) {
    %c0_i32 = arith.constant 0 : i32
    %c0_i32_0 = arith.constant 0 : i32
    %c0_i32_1 = arith.constant 0 : i32
    return %c0_i32, %c0_i32_0 : i32, i32
  }
  func.func @transform_6(%arg0: i32) -> (i32, i32) {
    %c0_i32 = arith.constant 0 : i32
    %c0_i32_0 = arith.constant 0 : i32
    return %arg0, %c0_i32 : i32, i32
  }
}

</mosaic_0001>

<bundles_post_ra>
// kernel: tpu_custom_call.1
= control target key start
LH: loop header
LB: loop body
LE: loop exit
PB: predicated region body
PF: predicated region fallthrough
CT: control target
= control target key end

     0   :  { %s1458_s0 = inlined_call_operand.hbm [shape: bf16[16,512], index: 0, kind: input, shape index: {}]   ;;  %s1459_s1 = inlined_call_operand.hbm [shape: bf16[512,128], index: 1, kind: input, shape index: {}]   ;;  %s1460_s2 = inlined_call_operand.vmem [shape: f32[1,128], index: 2, kind: input, shape index: {}]   ;;  %s1461_s3 = inlined_call_operand.hbm [shape: f32[16,128], index: 3, kind: input, shape index: {}]   ;;  %s1462_s4 = inlined_call_operand.vmem [shape: f32[1,128], index: 4, kind: input, shape index: {}]   ;;  %s1463_s5 = inlined_call_operand.vmem [shape: f32[1,128], index: 5, kind: input, shape index: {}]   ;;  %s1464_s6 = inlined_call_operand.hbm [shape: f32[16,128], index: 6, kind: output, shape index: {}]  }
   0x1   :  { %1468 = sst [smem:[#allocation16_spill]] %s1458_s0 }
   0x2   :  { %1469 = sst [smem:[#allocation17_spill]] %s1459_s1 }
   0x3   :  { %11 = vsyncpa [#allocation3], 0 }
   0x4   :  { %13 = vsyncpa [#allocation3 + $0x1], 0 }
   0x5   :  { %14 = vsyncpa [#allocation6], 0 }
   0x6   :  { %15 = vsyncpa [#allocation4], 0 }
   0x7   :  { %17 = vsyncpa [#allocation4 + $0x1], 0  ;;  %s1255_s21 = smov 0   ;;  %s1257_s22 = smov 0  }
   0x8   :  { %s1259_s23 = smov 0   ;;  %s1261_s24 = smov 0  }
   0x9 LB: > { %1470 = sst [smem:[#allocation13_spill]] %s1211_s23  ;;  %s1276_s25 = sadd.s32 4294967295, %s1215_s24   ;;  %s1215_s24 = sphi %s1261_s24, %s1483_s24   ;;  %s1211_s23 = sphi %s1259_s23, %s1485_s23   ;;  %s1207_s22 = sphi %s1257_s22, %s1487_s22   ;;  %s1203_s21 = sphi %s1255_s21, %s1486_s21  }
   0xa   : > { %s803_s26 = sadd.s32 4294967294, %s1215_s24   ;;  %s1280_s27 = sadd.s32 1, %s1215_s24  }
   0xb   : > { %1471 = sst [smem:[#allocation14_spill]] %s1280_s27  ;;  %s30_s28 = sadd.s32 1, %s1211_s23 }
   0xc   : > { %s27_s29 = ssub.s32 %s1215_s24, %s1280_s27  ;;  %p37_p0 = scmp.ne.s32.totalorder %s1211_s23, %s1207_s22 }
   0xd   : > { %p28_p1 = scmp.eq.s32.totalorder %s27_s29, 0  ;;  %p38_p2 = scmp.eq.s32.totalorder %s1215_s24, 0 }
   0xe   : > { %p43_p3 = scmp.ne.s32.totalorder %s1207_s22, %s1203_s21  ;;  %p177_p4 = scmp.eq.s32.totalorder %s1276_s25, 1 }
   0xf   : > { %s1292_s30 = scalar_select %p28_p1, %s1211_s23, %s30_s28  }
  0x10   : > { %p1294_p5 = por %p38_p2, %p37_p0  ;;  %p1298_p6 = por %p177_p4, %p37_p0 }
  0x11   : > { %1472 = sst [smem:[#allocation15_spill]] %s1292_s30  ;;  %p183_p7 = scmp.eq.s32.totalorder %s803_s26, 1 }
  0x12   : > { %p1008_p9 = scmp.lt.s32.totalorder %s1215_s24, 2  ;;  %s226_s10 = sand.u32 1, %s1215_s24  }
  0x13   : > { %p1307_p10 = por %p183_p7, %p43_p3  ;;  %s228_s11 = sand.u32 1, %s1211_s23  }
  0x14   : > { %s807_s12 = sshll.u32 %s228_s11, 4  ;;  %s949_s13 = sshll.u32 %s1215_s24, 4 }
  0x15   : > { %s1476_s0 = sld [smem:[#allocation16_spill]]  ;;  %s230_s18 = scalar_lea.vmem [#allocation2], %s807_s12 }
  0x16   : > { %s239_s19 = sshll.u32 %s230_s18, 4  ;;  %p1319_p11 = pnand %p1008_p9, %p1294_p5  ;;  %s240_s19 = int_to_ptr.vmem [resolvable:$true] %s239_s19 }
  0x17   : > { %s1323_s26 = sshll.u32 %s228_s11, 3  ;;  %p44_p12 = scmp.eq.s32.totalorder %s1276_s25, 0 }
  0x18   : > { %p190_p0 = scmp.lt.s32.totalorder %s1215_s24, 3  ;;  %s1328_s28 = scalar_lea.sflag [#allocation3], %s226_s10 }
  0x19   : > { %p1055_p2 = pneg %p1319_p11 }
  0x1b   : > { %s235_s16 = scalar_lea.hbm %s1476_s0, %s949_s13  ;;  %s1058_s11 = scalar_lea.hbm %s1476_s0, 32 }
  0x1c   : > { %s237_s17 = sshll.u32 %s235_s16, 4  ;;  %s238_s17 = int_to_ptr.hbm [resolvable:$true] %s237_s17 }
  0x1d   : > { %s1051_s29 = sshra.s32 %s238_s17, 4  ;;  %s1052_s29 = int_to_ptr.hbm [resolvable:$true] %s1051_s29 }
  0x1e   : > { %s1053_s12 = scalar_lea.hbm %s1052_s29, 16  ;;  %p1059_p7 = scmp.lt.s32.totalorder %s1052_s29, %s1476_s0 }
  0x1f   : > { %p1054_p1 = scmp.ne.s32.totalorder %s1052_s29, %s1053_s12  ;;  %p1060_p9 = scmp.lt.s32.totalorder %s1058_s11, %s1053_s12 }
  0x21   : > { %p1056_p4 = pnand %p1055_p2, %p1054_p1  ;;  %p1061_p8 = por %p1060_p9, %p1059_p7 }
  0x23   : > { %p1057_p5 = pneg %p1056_p4 }
  0x25   : > { %p1062_p13 = pnand %p1061_p8, %p1057_p5 }
  0x27   : > { %1065 = shalt.err (!%p1062_p13)
}
  0x28   : > { %999 = dma.hbm_to_vmem [thread:$0]  (!%p1319_p11), %s238_s17, 256, %s240_s19, %s1328_s28  }
  0x29   : > { %p1349_p1 = por %p44_p12, %p43_p3  ;;  %p1479_p8 = scmp.ge.s32.totalorder %s1215_s24, 1 }
  0x2a   : > { %s1481_s1 = sld [smem:[#allocation17_spill]]  ;;  %s1217_s17 = smov [#allocation5]  }
  0x2b   : > { %p1357_p13 = pnand %p1479_p8, %p190_p0  ;;  %s203_s19 = sshll.u32 %s1217_s17, 4  ;;  %s204_s19 = int_to_ptr.vmem [resolvable:$true] %s203_s19 }
  0x2c   : > { %s811_s7 = sshll.u32 %s1215_s24, 3  ;;  %s1218_s13 = smov 64  }
  0x2d   : > { %p992_p4 = pneg %p1357_p13  ;;  %s1219_s11 = smov 4  }
  0x2e   : > { %s254_s0 = scalar_lea.hbm %s1461_s3, %s811_s7  ;;  %s250_s18 = scalar_lea.vmem [#allocation7], %s1323_s26 }
  0x2f   : > { %p993_p3 = pnand %p992_p4, %p44_p12  ;;  %s258_s29 = sshll.u32 %s250_s18, 4  ;;  %s259_s29 = int_to_ptr.vmem [resolvable:$true] %s258_s29 }
  0x30   : > { %s201_s12 = sshll.u32 %s1481_s1, 4  ;;  %s256_s1 = sshll.u32 %s254_s0, 4  ;;  %s202_s12 = int_to_ptr.hbm [resolvable:$true] %s201_s12  ;;  %s257_s1 = int_to_ptr.hbm [resolvable:$true] %s256_s1 }
  0x31   : > { %995 = dma.hbm_to_vmem [thread:$0]  (!%p993_p3), %s202_s12, 4096, %s204_s19, [#allocation6], %s1218_s13, %s1218_s13, %s1219_s11  }
  0x32   : > { %s1111_s30 = sshra.s32 %s257_s1, 4  ;;  %s1118_s12 = scalar_lea.hbm %s1461_s3, 16  ;;  %s1112_s30 = int_to_ptr.hbm [resolvable:$true] %s1111_s30 }
  0x33   : > { %s1113_s17 = scalar_lea.hbm %s1112_s30, 8  ;;  %p1119_p9 = scmp.lt.s32.totalorder %s1112_s30, %s1461_s3 }
  0x34   : > { %p1114_p0 = scmp.ne.s32.totalorder %s1112_s30, %s1113_s17  ;;  %p1120_p8 = scmp.lt.s32.totalorder %s1118_s12, %s1113_s17 }
  0x36   : > { %p1116_p5 = pnand %p1114_p0, %p1055_p2  ;;  %p1121_p4 = por %p1120_p8, %p1119_p9 }
  0x38   : > { %p1117_p7 = pneg %p1116_p5 }
  0x3a   : > { %p1122_p3 = pnand %p1121_p4, %p1117_p7 }
  0x3c   : > { %1125 = shalt.err (!%p1122_p3)
}
  0x3d   : > { %1002 = dma.hbm_to_vmem [thread:$0]  (!%p1319_p11), %s257_s1, 128, %s259_s29, %s1328_s28  }
  0x3e   : > { %267 = sbr.rel (%p1357_p13) target bundleno = 404 (0x194), region = 44  ;;  %s269_s0 = sand.u32 (!%p1357_p13), 1, %s1276_s25  }
  0x3f   : > { %s1389_s23 = sand.u32 (!%p1357_p13), 1, %s1207_s22   ;;  %s270_s30 = scalar_lea.sflag (!%p1357_p13), [#allocation3], %s269_s0 }
  0x40   : > { %s813_s27 = sshll.u32 (!%p1357_p13), %s1389_s23, 4 }
  0x41   : > { %s1392_s26 = scalar_lea.vmem (!%p1357_p13), [#allocation2], %s813_s27 }
  0x43   : > { %1186 = dma.done.wait (%p1349_p1), %s270_s30, 256  }
  0x44   : > { %1188 = vsyncadd (%p1349_p1), %s270_s30, 4294967040 }
  0x45   : > { %1190 = dma.done.wait (%p44_p12), [#allocation6], 4096  }
  0x46   : > { %1192 = vsyncadd (%p44_p12), [#allocation6], 4294963200  ;;  %s815_s1 = sshll.u32 %s1389_s23, 3 }
  0x47   : > { %s1405_s20 = scalar_lea.vmem [#allocation7], %s815_s1 }
  0x48   : > { %1194 = dma.done.wait (%p1349_p1), %s270_s30, 128  }
  0x49   : > { %1196 = vsyncadd (%p1349_p1), %s270_s30, 4294967168  ;;  %v957_v0 = vld [vmem:[#allocation5 + $0x38] sm:$0xff]  ;;  %v956_v4 = vld [vmem:[#allocation5 + $0x30] sm:$0xff]  ;;  %s946_s16 = sshll.u32 %s1276_s25, 3  ;;  %s322_s25 = scalar_lea.vmem [#allocation8], %s815_s1 }
  0x4a   : > { %v965_v1 = vld [vmem:[#allocation5 + $0x78] sm:$0xff]  ;;  %599 = vmatpush.bf16.msra.mxu0 %v957_v0  ;;  %v964_v5 = vld [vmem:[#allocation5 + $0x70] sm:$0xff]  ;;  %v955_v8 = vld [vmem:[#allocation5 + $0x28] sm:$0xff]  ;;  %s698_s18 = scalar_lea.hbm %s1464_s6, %s946_s16  ;;  %s700_s12 = sshll.u32 %s322_s25, 4  ;;  %s701_s12 = int_to_ptr.vmem [resolvable:$true] %s700_s12 }
  0x4b   : > { %v973_v2 = vld [vmem:[#allocation5 + $0xb8] sm:$0xff]  ;;  %612 = vmatpush.bf16.msra.mxu1 %v965_v1  ;;  %v972_v6 = vld [vmem:[#allocation5 + $0xb0] sm:$0xff]  ;;  %v963_v9 = vld [vmem:[#allocation5 + $0x68] sm:$0xff]  ;;  %s702_s19 = sshll.u32 %s698_s18, 4  ;;  %s688_s13 = scalar_lea.sflag [#allocation4], %s1389_s23  ;;  %s703_s19 = int_to_ptr.hbm [resolvable:$true] %s702_s19 }
  0x4c   : > { %v981_v3 = vld [vmem:[#allocation5 + $0xf8] sm:$0xff]  ;;  %625 = vmatpush.bf16.msra.mxu2 %v973_v2  ;;  %v980_v7 = vld [vmem:[#allocation5 + $0xf0] sm:$0xff]  ;;  %v971_v10 = vld [vmem:[#allocation5 + $0xa8] sm:$0xff]  ;;  %s1155_s0 = sshra.s32 %s703_s19, 4  ;;  %s1156_s0 = int_to_ptr.hbm [resolvable:$true] %s1155_s0 }
  0x4d   : > { %638 = vmatpush.bf16.msra.mxu3 %v981_v3  ;;  %v979_v11 = vld [vmem:[#allocation5 + $0xe8] sm:$0xff]  ;;  %v954_v12 = vld [vmem:[#allocation5 + $0x20] sm:$0xff]  ;;  %v953_v16 = vld [vmem:[#allocation5 + $0x18] sm:$0xff]  ;;  %s1157_s27 = scalar_lea.hbm %s1156_s0, 8  ;;  %p1162_p1 = scmp.lt.s32.totalorder %s1156_s0, %s1464_s6 }
  0x4e   : > { %600 = vmatpush.bf16.msra.mxu0 %v956_v4  ;;  %v962_v13 = vld [vmem:[#allocation5 + $0x60] sm:$0xff]  ;;  %v961_v17 = vld [vmem:[#allocation5 + $0x58] sm:$0xff]  ;;  %v952_v20 = vld [vmem:[#allocation5 + $0x10] sm:$0xff]  ;;  %p1158_p11 = scmp.ne.s32.totalorder %s1156_s0, %s1157_s27 }
  0x4f   : > { %613 = vmatpush.bf16.msra.mxu1 %v964_v5  ;;  %v970_v14 = vld [vmem:[#allocation5 + $0xa0] sm:$0xff]  ;;  %v969_v18 = vld [vmem:[#allocation5 + $0x98] sm:$0xff]  ;;  %v960_v21 = vld [vmem:[#allocation5 + $0x50] sm:$0xff] }
  0x50   : > { %626 = vmatpush.bf16.msra.mxu2 %v972_v6  ;;  %v978_v15 = vld [vmem:[#allocation5 + $0xe0] sm:$0xff]  ;;  %v977_v19 = vld [vmem:[#allocation5 + $0xd8] sm:$0xff]  ;;  %v968_v22 = vld [vmem:[#allocation5 + $0x90] sm:$0xff]  ;;  %p1159_p12 = pnand %p1158_p11, %p1298_p6 }
  0x51   : > { %639 = vmatpush.bf16.msra.mxu3 %v980_v7  ;;  %v976_v23 = vld [vmem:[#allocation5 + $0xd0] sm:$0xff]  ;;  %v951_v24 = vld [vmem:[#allocation5 + $0x8] sm:$0xff]  ;;  %v950_v32 = vld [vmem:[#allocation5] sm:$0xff] }
  0x52   : > { %601 = vmatpush.bf16.msra.mxu0 %v955_v8  ;;  %v959_v25 = vld [vmem:[#allocation5 + $0x48] sm:$0xff]  ;;  %v323_v26 = vld [vmem:[%s1392_s26] sm:$0xff]  ;;  %p1160_p2 = pneg %p1159_p12 }
  0x53   : > { %614 = vmatpush.bf16.msra.mxu1 %v963_v9  ;;  %v967_v27 = vld [vmem:[#allocation5 + $0x88] sm:$0xff]  ;;  %v395_v30 = vunpack.c.l.b16 %v323_v26  ;;  %v396_v31 = vunpack.c.h.b16 %v323_v26  ;;  %v958_v33 = vld [vmem:[#allocation5 + $0x40] sm:$0xff] }
  0x54   : > { %627 = vmatpush.bf16.msra.mxu2 %v971_v10  ;;  %v975_v28 = vld [vmem:[#allocation5 + $0xc8] sm:$0xff]  ;;  %v966_v36 = vld [vmem:[#allocation5 + $0x80] sm:$0xff] }
  0x55   : > { %640 = vmatpush.bf16.msra.mxu3 %v979_v11  ;;  %v324_v29 = vld [vmem:[%s1392_s26 + $0x8] sm:$0xff]  ;;  %v974_v37 = vld [vmem:[#allocation5 + $0xc0] sm:$0xff]  ;;  %v399_v38 = vpack.c.b16 %v395_v30, %v395_v30  ;;  %v400_v39 = vpack.c.b16 %v396_v31, %v396_v31 }
  0x56   : > { %602 = vmatpush.bf16.msra.mxu0 %v954_v12  ;;  %v397_v34 = vunpack.c.l.b16 %v324_v29  ;;  %v398_v35 = vunpack.c.h.b16 %v324_v29  ;;  %v1046_v42 = vld [vmem:[%s1460_s2] ss:$0 sm:$0xff] }
  0x57   : > { %615 = vmatpush.bf16.msra.mxu1 %v962_v13  ;;  %v651_v52 = vld [vmem:[%s1405_s20] sm:$0xff]  ;;  %s1161_s20 = scalar_lea.hbm %s1464_s6, 16 }
  0x58   : > { %628 = vmatpush.bf16.msra.mxu2 %v970_v14  ;;  %v401_v40 = vpack.c.b16 %v397_v34, %v397_v34  ;;  %v402_v41 = vpack.c.b16 %v398_v35, %v398_v35  ;;  %v1047_v9 = vld [vmem:[%s1462_s4] ss:$0 sm:$0xff]  ;;  %p1163_p13 = scmp.lt.s32.totalorder %s1161_s20, %s1157_s27 }
  0x59   : > { %641 = vmatpush.bf16.msra.mxu3 %v978_v15  ;;  %v1048_v12 = vld [vmem:[%s1463_s5] ss:$0 sm:$0xff] }
  0x5a   : > { %603 = vmatpush.bf16.msra.mxu0 %v953_v16  ;;  %p1164_p0 = por %p1163_p13, %p1162_p1 }
  0x5b   : > { %616 = vmatpush.bf16.msra.mxu1 %v961_v17 }
  0x5c   : > { %629 = vmatpush.bf16.msra.mxu2 %v969_v18  ;;  %p1165_p5 = pnand %p1164_p0, %p1160_p2 }
  0x5d   : > { %642 = vmatpush.bf16.msra.mxu3 %v977_v19 }
  0x5e   : > { %604 = vmatpush.bf16.msra.mxu0 %v952_v20 }
  0x5f   : > { %617 = vmatpush.bf16.msra.mxu1 %v960_v21 }
  0x60   : > { %630 = vmatpush.bf16.msra.mxu2 %v968_v22 }
  0x61   : > { %643 = vmatpush.bf16.msra.mxu3 %v976_v23 }
  0x62   : > { %605 = vmatpush.bf16.msra.mxu0 %v951_v24 }
  0x63   : > { %618 = vmatpush.bf16.msra.mxu1 %v959_v25 }
  0x64   : > { %631 = vmatpush.bf16.msra.mxu2 %v967_v27 }
  0x65   : > { %644 = vmatpush.bf16.msra.mxu3 %v975_v28 }
  0x66   : > { %606 = vmatpush.bf16.msra.mxu0 %v950_v32 }
  0x67   : > { %619 = vmatpush.bf16.msra.mxu1 %v958_v33 }
  0x68   : > { %632 = vmatpush.bf16.msra.mxu2 %v966_v36 }
  0x69   : > { %645 = vmatpush.bf16.msra.mxu3 %v974_v37  ;;  %607 = vmatmul.bf16.vlgmr.msra.gmra.mxu0 %v399_v38 }
  0x6a   : > { %620 = vmatmul.bf16.vlgmr.msra.gmra.mxu1 %v400_v39 }
  0x6b   : > { %633 = vmatmul.bf16.vlgmr.msra.gmra.mxu2 %v401_v40 }
  0x6c   : > { %646 = vmatmul.bf16.vlgmr.msra.gmra.mxu3 %v402_v41 }
  0xe6   : > { %v608_v43 = vpop.f32.mrf.mxu0 }
  0xe7   : > { %v621_v44 = vpop.f32.mrf.mxu1  ;;  %v609_v45 = vadd.f32 %v1046_v42, %v608_v43 }
  0xe9   : > { %v622_v46 = vadd.f32 %v621_v44, %v609_v45 }
  0xee   : > { %v634_v47 = vpop.f32.mrf.mxu2  ;;  %v610_v50 = vpop.f32.mrf.mxu0 }
  0xef   : > { %v647_v48 = vpop.f32.mrf.mxu3  ;;  %v635_v49 = vadd.f32 %v634_v47, %v622_v46  ;;  %v623_v51 = vpop.f32.mrf.mxu1 }
  0xf1   : > { %v648_v53 = vadd.f32 %v647_v48, %v635_v49 }
  0xf3   : > { %v652_v54 = vadd.f32 %v651_v52, %v648_v53 }
  0xf5   : > { %655 = vadd.xlane.f32.xlu0 %v652_v54  ;;  %v657_v57 = vmul.f32 %v652_v54, %v652_v54 }
  0xf6   : > { %v636_v55 = vpop.f32.mrf.mxu2 }
  0xf7   : > { %v649_v56 = vpop.f32.mrf.mxu3 }
  0xfd   : > { %658 = vadd.xlane.f32.xlu0 %v657_v57 }
 0x168   : > { %v656_v58 = vpop.xlane.xlu0 %655 }
 0x169   : > { %v660_v59 = vmul.f32 0.0078125, %v656_v58 }
 0x16b   : > { %v662_v61 = vmul.f32 %v660_v59, %v660_v59  ;;  %v676_v8 = vsub.f32 %v652_v54, %v660_v59 }
 0x170   : > { %v659_v60 = vpop.xlane.xlu0 %658 }
 0x171   : > { %v661_v62 = vmul.f32 0.0078125, %v659_v60 }
 0x173   : > { %v663_v63 = vsub.f32 %v661_v62, %v662_v61 }
 0x175   : > { %v664_v0 = vmax.f32 %v663_v63, 0.0 }
 0x177   : > { %v665_v1 = vadd.f32 1e-12, %v664_v0 }
 0x179   : > { %1049 = vrsqrt.f32 %v665_v1  ;;  %vm672_vm1 = vweird.f32 %v665_v1 }
 0x17f   : > { %v1050_v2 = vpop.eup %1049 }
 0x180   : > { %v667_v3 = vmul.f32 %v1050_v2, %v665_v1  ;;  %vm673_vm0 = vweird.f32 %v1050_v2 }
 0x181   : > { %vm674_vm2 = vmor %vm672_vm1, %vm673_vm0 }
 0x182   : > { %v668_v4 = vmul.f32 %v1050_v2, %v667_v3 }
 0x184   : > { %v669_v5 = vmul.f32 0.5, %v668_v4 }
 0x186   : > { %v670_v6 = vsub.f32 1.5, %v669_v5 }
 0x188   : > { %v671_v7 = vmul.f32 %v1050_v2, %v670_v6 }
 0x18a   : > { %v675_v10 = vsel %vm674_vm2, %v1050_v2, %v671_v7 }
 0x18b   : > { %v677_v11 = vmul.f32 %v676_v8, %v675_v10 }
 0x18d   : > { %v681_v13 = vmul.f32 %v1047_v9, %v677_v11 }
 0x18f   : > { %v685_v14 = vadd.f32 %v1048_v12, %v681_v13 }
 0x191   : > { %686 = vst [vmem:[%s322_s25] sm:$0xff] %v685_v14 }
 0x192   : > { %1168 = shalt.err (!%p1165_p5)
}
 0x193   : > { %990 = dma.vmem_to_hbm [thread:$0]  (%p1298_p6), %s701_s12, 128, %s703_s19, %s688_s13  }
 0x194 PF: > { %s714_s23 = sand.u32 1, %s1203_s21   ;;  %p1482_p7 = scmp.ge.s32.totalorder %s1215_s24, 2 }
 0x195   : > { %s715_s10 = scalar_lea.sflag [#allocation4], %s714_s23 }
 0x196   : > { %p1004_p9 = pnand %p1482_p7, %p1307_p10 }
 0x198   : > { %p1005_p8 = pneg %p1004_p9 }
 0x19a   : > { %1198 = dma.done.wait (%p1005_p8), %s715_s10, 128  }
 0x19b   : > { %1200 = vsyncadd (%p1005_p8), %s715_s10, 4294967168  ;;  %s1483_s24 = sld [smem:[#allocation14_spill]]  ;;  %s1486_s21 = smov %s1207_s22 }
 0x19c   : > { %s1484_s16 = sld [smem:[#allocation13_spill]] }
 0x19d   : > { %s1485_s23 = sld [smem:[#allocation15_spill]] }
 0x1a1   : > { %p20_p4 = scmp.ge.s32.totalorder %s1483_s24, 4  }
 0x1a2   : > { %s1487_s22 = smov %s1484_s16 }
 0x1a3   :  { %22 = sbr.rel (!%p20_p4) target bundleno = 9 (0x9), region = 104 }
 0x1a8   :  { %721 = vsyncpa [#allocation3], 1 }
 0x1a9   :  { %723 = vsyncpa [#allocation3 + $0x1], 1 }
 0x1aa   :  { %724 = vsyncpa [#allocation6], 1 }
 0x1ab   :  { %725 = vsyncpa [#allocation4], 1 }
 0x1ac   :  { %727 = vsyncpa [#allocation4 + $0x1], 1 }

</bundles_post_ra>
